<compile_context>
chip_gen: v5e
topology: v5e:2x2
jax: 0.10.0
libtpu: 0.0.40
codegen_flags: <defaults>
</compile_context>

<pallas_src>
import jax
import jax.numpy as jnp
from jax.experimental import pallas as pl
from jax.experimental.pallas import tpu as pltpu


def _pa_kernel(w_ref, b_ref, x_ref, o_ref):
    """Pixel attention on one (C, T) tile.

    w_ref : VMEM (C, C)  conv weight [out_ch, in_ch]
    b_ref : VMEM (C, 1)  conv bias
    x_ref : VMEM (C, T)  input tile, T = lane-dense spatial chunk of H*W
    o_ref : VMEM (C, T)  output tile
    """
    C = x_ref.shape[0]
    xf = x_ref[...].astype(jnp.float32)                  # single load/cast, reused
    b = b_ref[...].astype(jnp.float32)                   # (C, 1)

    if C >= 16:
        # Large channel counts: channel mix on the MXU.
        y = jnp.dot(w_ref[...].astype(jnp.float32), xf,
                    preferred_element_type=jnp.float32) + b
    else:
        # Small channel counts (typical PA): C broadcast FMAs on the VPU.
        y = b                                             # (C, 1) -> broadcasts
        for ci in range(C):                               # static unroll, C = nf
            wcol = w_ref[:, ci:ci + 1].astype(jnp.float32)  # (C, 1) lane-broadcast
            y = y + wcol * xf[ci:ci + 1, :]               # (C,1)*(1,T) -> (C,T)

    y = jax.nn.sigmoid(y)                                 # EUP
    o_ref[...] = (xf * y).astype(o_ref.dtype)             # one lane-dense store


def pa_forward(x_nchw, weight, bias, *, max_block_bytes=2 * 1024 * 1024):
    """Pixel attention: out = x * sigmoid(Conv2d(nf, nf, 1)(x)).

    x_nchw : (N, C, H, W) float32
    weight : (C_out, C_in) float32   (PyTorch Conv2d 1x1 weight squeezed)
    bias   : (C_out,)      float32
    """
    N, C, H, W = x_nchw.shape
    HW = H * W
    x3 = x_nchw.reshape(N, C, HW)                 # free view, no transpose
    w2 = weight.astype(jnp.float32)               # (C, C)
    b2 = bias.reshape(C, 1).astype(jnp.float32)   # (C, 1)

    # Lane-dense spatial tile: multiple of 128 (or the full H*W extent), capped
    # so double-buffered input + output blocks stay well under scoped VMEM.
    itemsize = x3.dtype.itemsize
    cap = max(128, (max_block_bytes // (C * itemsize)) // 128 * 128)
    if HW <= cap:
        tile_hw = HW                              # full dim -> no 128 constraint
        HW_p = HW
    else:
        tile_hw = cap
        HW_p = pl.cdiv(HW, tile_hw) * tile_hw
        if HW_p != HW:                            # zero-pad tail; sliced off below
            x3 = jnp.pad(x3, ((0, 0), (0, 0), (0, HW_p - HW)))

    grid = (N, HW_p // tile_hw)

    out3 = pl.pallas_call(
        _pa_kernel,
        out_shape=jax.ShapeDtypeStruct((N, C, HW_p), x3.dtype),
        grid_spec=pltpu.PrefetchScalarGridSpec(
            num_scalar_prefetch=0,
            grid=grid,
            in_specs=[
                pl.BlockSpec((C, C), lambda n, h: (0, 0)),            # weight
                pl.BlockSpec((C, 1), lambda n, h: (0, 0)),            # bias
                pl.BlockSpec((None, C, tile_hw), lambda n, h: (n, 0, h)),
            ],
            out_specs=pl.BlockSpec((None, C, tile_hw), lambda n, h: (n, 0, h)),
        ),
        compiler_params=pltpu.CompilerParams(
            dimension_semantics=("parallel", "parallel")),
    )(w2, b2, x3)

    if HW_p != HW:
        out3 = out3[:, :, :HW]
    return out3.reshape(N, C, H, W)               # free view back to NCHW


def pa_reference(x_nchw, weight, bias):
    """Pure-JAX reference matching the PyTorch module."""
    y = jnp.einsum("nchw,oc->nohw", x_nchw, weight) + bias[None, :, None, None]
    y = jax.nn.sigmoid(y)
    return x_nchw * y


if __name__ == "__main__":
    key = jax.random.PRNGKey(0)
    k_x, k_w, k_b = jax.random.split(key, 3)

    N, C, H, W = 2, 4, 16, 16  # nf = 4
    x = jax.random.normal(k_x, (N, C, H, W), dtype=jnp.float32)
    # Deterministic Conv2d(nf, nf, 1) parameters (synthetic init)
    weight = jax.random.normal(k_w, (C, C), dtype=jnp.float32) * 0.1
    bias = jax.random.normal(k_b, (C,), dtype=jnp.float32) * 0.1

    out = pa_forward(x, weight, bias)
    out = jax.block_until_ready(out)

    ref = pa_reference(x, weight, bias)
    assert out.shape == (N, C, H, W)
    assert jnp.allclose(out, ref, atol=1e-5, rtol=1e-5), (
        float(jnp.max(jnp.abs(out - ref))))

    print("KERNEL_OK")
</pallas_src>

<mosaic_0001>
module attributes {stable_mosaic.version = 11 : i64} {
  func.func @_pa_kernel(%arg0: i32, %arg1: i32, %arg2: memref<4x4xf32, #tpu.memory_space<vmem>>, %arg3: memref<4x1xf32, #tpu.memory_space<vmem>>, %arg4: memref<1x4x256xf32, #tpu.memory_space<vmem>>, %arg5: memref<1x4x256xf32, #tpu.memory_space<vmem>>) attributes {dimension_semantics = [#tpu.dimension_semantics<parallel>, #tpu.dimension_semantics<parallel>], iteration_bounds = array<i64: 2, 1>, scalar_prefetch = 0 : i64, scratch_operands = 0 : i64, tpu.core_type = #tpu.core_type<tc>, window_params = [{pipeline_mode = #tpu.pipeline_mode<synchronous>, transform_indices = @transform_0, window_bounds = array<i64: 4, 4>}, {pipeline_mode = #tpu.pipeline_mode<synchronous>, transform_indices = @transform_1, window_bounds = array<i64: 4, 1>}, {transform_indices = @transform_2, window_bounds = array<i64: 1, 4, 256>}, {transform_indices = @transform_3, window_bounds = array<i64: 1, 4, 256>}]} {
    %c0 = arith.constant 0 : index
    %c0_0 = arith.constant 0 : index
    %c0_1 = arith.constant 0 : index
    %0 = vector.load %arg4[%c0, %c0_0, %c0_1] : memref<1x4x256xf32, #tpu.memory_space<vmem>>, vector<1x4x256xf32>
    %1 = vector.shape_cast %0 : vector<1x4x256xf32> to vector<4x256xf32>
    %c0_2 = arith.constant 0 : index
    %c0_3 = arith.constant 0 : index
    %2 = vector.load %arg3[%c0_2, %c0_3] : memref<4x1xf32, #tpu.memory_space<vmem>>, vector<4x1xf32>
    %c0_4 = arith.constant 0 : index
    %c0_5 = arith.constant 0 : index
    %3 = vector.load %arg2[%c0_4, %c0_5] : memref<4x4xf32, #tpu.memory_space<vmem>>, vector<4x1xf32>
    %4 = vector.extract_strided_slice %1 {offsets = [0, 0], sizes = [1, 256], strides = [1, 1]} : vector<4x256xf32> to vector<1x256xf32>
    %5 = vector.broadcast %3 : vector<4x1xf32> to vector<4x256xf32>
    %6 = vector.broadcast %4 : vector<1x256xf32> to vector<4x256xf32>
    %7 = arith.mulf %5, %6 : vector<4x256xf32>
    %8 = vector.broadcast %2 : vector<4x1xf32> to vector<4x256xf32>
    %9 = arith.addf %8, %7 : vector<4x256xf32>
    %c0_6 = arith.constant 0 : index
    %c1 = arith.constant 1 : index
    %10 = vector.load %arg2[%c0_6, %c1] : memref<4x4xf32, #tpu.memory_space<vmem>>, vector<4x1xf32>
    %11 = vector.extract_strided_slice %1 {offsets = [1, 0], sizes = [1, 256], strides = [1, 1]} : vector<4x256xf32> to vector<1x256xf32>
    %12 = vector.broadcast %10 : vector<4x1xf32> to vector<4x256xf32>
    %13 = vector.broadcast %11 : vector<1x256xf32> to vector<4x256xf32>
    %14 = arith.mulf %12, %13 : vector<4x256xf32>
    %15 = arith.addf %9, %14 : vector<4x256xf32>
    %c0_7 = arith.constant 0 : index
    %c2 = arith.constant 2 : index
    %16 = vector.load %arg2[%c0_7, %c2] : memref<4x4xf32, #tpu.memory_space<vmem>>, vector<4x1xf32>
    %17 = vector.extract_strided_slice %1 {offsets = [2, 0], sizes = [1, 256], strides = [1, 1]} : vector<4x256xf32> to vector<1x256xf32>
    %18 = vector.broadcast %16 : vector<4x1xf32> to vector<4x256xf32>
    %19 = vector.broadcast %17 : vector<1x256xf32> to vector<4x256xf32>
    %20 = arith.mulf %18, %19 : vector<4x256xf32>
    %21 = arith.addf %15, %20 : vector<4x256xf32>
    %c0_8 = arith.constant 0 : index
    %c3 = arith.constant 3 : index
    %22 = vector.load %arg2[%c0_8, %c3] : memref<4x4xf32, #tpu.memory_space<vmem>>, vector<4x1xf32>
    %23 = vector.extract_strided_slice %1 {offsets = [3, 0], sizes = [1, 256], strides = [1, 1]} : vector<4x256xf32> to vector<1x256xf32>
    %24 = vector.broadcast %22 : vector<4x1xf32> to vector<4x256xf32>
    %25 = vector.broadcast %23 : vector<1x256xf32> to vector<4x256xf32>
    %26 = arith.mulf %24, %25 : vector<4x256xf32>
    %27 = arith.addf %21, %26 : vector<4x256xf32>
    %28 = arith.negf %27 : vector<4x256xf32>
    %29 = math.exp %28 : vector<4x256xf32>
    %cst = arith.constant 1.000000e+00 : f32
    %30 = vector.broadcast %cst : f32 to vector<4x256xf32>
    %31 = arith.addf %30, %29 : vector<4x256xf32>
    %32 = arith.divf %30, %31 : vector<4x256xf32>
    %33 = arith.mulf %1, %32 : vector<4x256xf32>
    %c0_9 = arith.constant 0 : index
    %c0_10 = arith.constant 0 : index
    %c0_11 = arith.constant 0 : index
    %34 = vector.load %arg5[%c0_9, %c0_10, %c0_11] : memref<1x4x256xf32, #tpu.memory_space<vmem>>, vector<1x4x256xf32>
    %35 = vector.shape_cast %34 : vector<1x4x256xf32> to vector<4x256xf32>
    %36 = vector.shape_cast %33 : vector<4x256xf32> to vector<1x4x256xf32>
    tpu.vector_store %arg5[%c0_9, %c0_10, %c0_11], %36 {strides = array<i32>} : memref<1x4x256xf32, #tpu.memory_space<vmem>>, vector<1x4x256xf32>,
    return
  }
  func.func @transform_0(%arg0: i32, %arg1: i32) -> (i32, i32) {
    %c0_i32 = arith.constant 0 : i32
    %c0_i32_0 = arith.constant 0 : i32
    %c0_i32_1 = arith.constant 0 : i32
    return %c0_i32, %c0_i32_0 : i32, i32
  }
  func.func @transform_1(%arg0: i32, %arg1: i32) -> (i32, i32) {
    %c0_i32 = arith.constant 0 : i32
    %c0_i32_0 = arith.constant 0 : i32
    %c0_i32_1 = arith.constant 0 : i32
    return %c0_i32, %c0_i32_0 : i32, i32
  }
  func.func @transform_2(%arg0: i32, %arg1: i32) -> (i32, i32, i32) {
    %c0_i32 = arith.constant 0 : i32
    %c0_i32_0 = arith.constant 0 : i32
    return %arg0, %c0_i32, %arg1 : i32, i32, i32
  }
  func.func @transform_3(%arg0: i32, %arg1: i32) -> (i32, i32, i32) {
    %c0_i32 = arith.constant 0 : i32
    %c0_i32_0 = arith.constant 0 : i32
    return %arg0, %c0_i32, %arg1 : i32, i32, i32
  }
}

</mosaic_0001>

<bundles_post_ra>
// kernel: tpu_custom_call.1
= control target key start
LH: loop header
LB: loop body
LE: loop exit
PB: predicated region body
PF: predicated region fallthrough
CT: control target
= control target key end

     0   :  { %8 = vsyncpa [#allocation3], 0  ;;  %s807_s0 = inlined_call_operand.vmem [shape: f32[4,4], index: 0, kind: input, shape index: {}]   ;;  %s808_s1 = inlined_call_operand.vmem [shape: f32[4,1], index: 1, kind: input, shape index: {}]   ;;  %s809_s2 = inlined_call_operand.hbm [shape: f32[2,4,256], index: 2, kind: input, shape index: {}]   ;;  %s810_s3 = inlined_call_operand.hbm [shape: f32[2,4,256], index: 3, kind: output, shape index: {}]  }
   0x1   :  { %10 = vsyncpa [#allocation3 + $0x1], 0 }
   0x2   :  { %11 = vsyncpa [#allocation4], 0 }
   0x3   :  { %13 = vsyncpa [#allocation4 + $0x1], 0  ;;  %s660_s12 = smov 0   ;;  %s662_s13 = smov 0  }
   0x4   :  { %s664_s14 = smov 0   ;;  %s666_s15 = smov 0  }
   0x5   :  { %s668_s16 = smov 0   ;;  %s670_s17 = smov 0  }
   0x6 LB: > { %s424_s18 = sadd.s32 4294967295, %s634_s17   ;;  %s425_s19 = sadd.s32 4294967294, %s634_s17   ;;  %s634_s17 = sphi %s670_s17, %s19_s17   ;;  %s630_s16 = sphi %s668_s16, %s821_s16   ;;  %s626_s15 = sphi %s666_s15, %s820_s15   ;;  %s622_s14 = sphi %s664_s14, %s819_s14   ;;  %s618_s13 = sphi %s662_s13, %s818_s13   ;;  %s614_s12 = sphi %s660_s12, %s817_s12  }
   0x7   : > { %s31_s20 = sadd.s32 1, %s630_s16  ;;  %s82_s21 = sadd.s32 1, %s622_s14 }
   0x8   : > { %p33_p0 = scmp.ge.s32.totalorder %s31_s20, 2  ;;  %p89_p1 = scmp.ne.s32.totalorder %s622_s14, %s618_s13 }
   0x9   : > { %p90_p2 = scmp.eq.s32.totalorder %s634_s17, 0  ;;  %p95_p3 = scmp.ne.s32.totalorder %s618_s13, %s614_s12 }
   0xa   : > { %s823_s20 = smov (%p33_p0, %s31_s20), 0  ;;  %p96_p5 = scmp.eq.s32.totalorder %s424_s18, 0 }
   0xb   : > { %p701_p4 = por %p90_p2, %p89_p1  ;;  %s77_s23 = ssub.s32 %s630_s16, %s823_s20 }
   0xc   : > { %p121_p6 = scmp.eq.s32.totalorder %s424_s18, 1  ;;  %p80_p7 = scmp.eq.s32.totalorder %s77_s23, 0 }
   0xd   : > { %p707_p8 = por %p96_p5, %p95_p3  ;;  %p127_p10 = scmp.eq.s32.totalorder %s425_s19, 1 }
   0xe   : > { %p711_p9 = por %p121_p6, %p89_p1  ;;  %p427_p12 = scmp.ge.s32.totalorder %s634_s17, 2 }
   0xf   : > { %s716_s26 = scalar_select %p80_p7, %s622_s14, %s82_s21  }
  0x10   : > { %p718_p11 = por %p127_p10, %p95_p3  ;;  %p455_p13 = scmp.lt.s32.totalorder %s634_s17, 2 }
  0x11   : > { %s153_s28 = sand.u32 1, %s622_s14   ;;  %s441_s30 = sshll.u32 %s630_s16, 3 }
  0x12   : > { %s428_s29 = sshll.u32 %s153_s28, 3  ;;  %s164_s6 = scalar_lea.hbm %s809_s2, %s441_s30 }
  0x13   : > { %s157_s7 = scalar_lea.vmem [#allocation2], %s428_s29  ;;  %s166_s9 = sshll.u32 %s164_s6, 4  ;;  %s167_s9 = int_to_ptr.hbm [resolvable:$true] %s166_s9 }
  0x14   : > { %s168_s8 = sshll.u32 %s157_s7, 4  ;;  %p448_p0 = pnand %p455_p13, %p701_p4  ;;  %s169_s8 = int_to_ptr.vmem [resolvable:$true] %s168_s8 }
  0x15   : > { %p431_p1 = scmp.ge.s32.totalorder %s634_s17, 1  ;;  %p173_p2 = scmp.lt.s32.totalorder %s634_s17, 3 }
  0x16   : > { %s154_s10 = scalar_lea.sflag [#allocation3], %s153_s28 }
  0x17   : > { %450 = dma.hbm_to_vmem [thread:$0]  (!%p448_p0), %s167_s9, 128, %s169_s8, %s154_s10  }
  0x18   : > { %p174_p3 = pnand %p431_p1, %p173_p2 }
  0x19   : > { %s734_s11 = sand.u32 (!%p174_p3), 1, %s618_s13  }
  0x1a   : > { %177 = sbr.rel (%p174_p3) target bundleno = 202 (0xca), region = 32  ;;  %s432_s18 = sshll.u32 (!%p174_p3), %s734_s11, 3 }
  0x1b   : > { %s180_s19 = scalar_lea.sflag (!%p174_p3), [#allocation3], %s734_s11  ;;  %s183_s21 = scalar_lea.vmem (!%p174_p3), [#allocation2], %s432_s18 }
  0x1f   : > { %605 = dma.done.wait (%p707_p8), %s180_s19, 128  }
  0x20   : > { %607 = vsyncadd (%p707_p8), %s180_s19, 4294967168  ;;  %v636_v0 = vmov 0   ;;  %v637_v1 = vmov 1   ;;  %v638_v2 = vmov 3   ;;  %v211_v3 = vld [vmem:[%s807_s0] sm:$0xf] }
  0x21   : > { %509 = vset.pattern.permute.xlu0 %v636_v0  ;;  %510 = vset.pattern.permute.xlu1 %v637_v1  ;;  %v210_v4 = vld [vmem:[%s808_s1] sm:$0xf]  ;;  %v639_v5 = vmov 2   ;;  %s442_s24 = sshll.u32 %s626_s15, 3  ;;  %vm316_vm7 = vcmask 1043456   ;;  %s206_s15 = scalar_lea.vmem [#allocation5], %s432_s18 }
  0x22   : > { %512 = vset.pattern.permute.xlu2 %v638_v2  ;;  %214 = vperm.xlu0 %509, %v211_v3   ;;  %v750_v6 = vld [vmem:[%s183_s21] sm:$0xff]  ;;  %s335_s5 = scalar_lea.hbm %s810_s3, %s442_s24  ;;  %s337_s6 = sshll.u32 %s206_s15, 4  ;;  %s338_s6 = int_to_ptr.vmem [resolvable:$true] %s337_s6 }
  0x23   : > { %234 = vperm.xlu1 %510, %v211_v3   ;;  %262 = vperm.xlu2 %512, %v211_v3   ;;  %v218_v7 = vperm.slane %v750_v6, 0  ;;  %v219_v8 = vperm.slane %v750_v6, 4  ;;  %v237_v11 = vperm.slane %v750_v6, 1  ;;  %v238_v12 = vperm.slane %v750_v6, 5  ;;  %s339_s7 = sshll.u32 %s335_s5, 4  ;;  %s322_s8 = scalar_lea.sflag [#allocation4], %s734_s11  ;;  %s340_s7 = int_to_ptr.hbm [resolvable:$true] %s339_s7 }
  0x24   : > { %v251_v13 = vperm.slane %v750_v6, 2  ;;  %v252_v14 = vperm.slane %v750_v6, 6  ;;  %v265_v17 = vperm.slane %v750_v6, 3  ;;  %v266_v18 = vperm.slane %v750_v6, 7  ;;  %s566_s9 = sshra.s32 %s340_s7, 4  ;;  %s572_s18 = scalar_lea.hbm %s810_s3, 16  ;;  %s567_s9 = int_to_ptr.hbm [resolvable:$true] %s566_s9 }
  0x25   : > { %v222_v15 = vperm.slane %v218_v7, 0  ;;  %v223_v16 = vperm.slane %v219_v8, 0  ;;  %v241_v19 = vperm.slane %v237_v11, 1  ;;  %v242_v20 = vperm.slane %v238_v12, 1  ;;  %s568_s10 = scalar_lea.hbm %s567_s9, 8  ;;  %p573_p7 = scmp.lt.s32.totalorder %s567_s9, %s810_s3 }
  0x26   : > { %v255_v21 = vperm.slane %v251_v13, 2  ;;  %v256_v22 = vperm.slane %v252_v14, 2  ;;  %v269_v25 = vperm.slane %v265_v17, 3  ;;  %v270_v26 = vperm.slane %v266_v18, 3  ;;  %p569_p4 = scmp.ne.s32.totalorder %s567_s9, %s568_s10  ;;  %p574_p8 = scmp.lt.s32.totalorder %s572_s18, %s568_s10 }
  0x28   : > { %p570_p5 = pnand %p569_p4, %p711_p9  ;;  %p575_p10 = por %p574_p8, %p573_p7 }
  0x2a   : > { %228 = vperm.xlu0 %509, %v210_v4   ;;  %p571_p6 = pneg %p570_p5 }
  0x2b   : > { %511 = vset.pattern.permute.xlu1 %v639_v5 }
  0x2c   : > { %248 = vperm.xlu1 %511, %v211_v3   ;;  %p576_p13 = pnand %p575_p10, %p571_p6 }
  0x32   : > { %513 = vset.pattern.permute.xlu0 %v638_v2 }
  0x7d   : > { %v263_v28 = vpop.permute.xlu2 %262 }
  0x7e   : > { %v271_v38 = vmul.f32 %v269_v25, %v263_v28  ;;  %v272_v39 = vmul.f32 %v270_v26, %v263_v28 }
  0x94   : > { %v215_v9 = vpop.permute.xlu0 %214 }
  0x95   : > { %v235_v10 = vpop.permute.xlu1 %234  ;;  %v224_v23 = vmul.f32 %v222_v15, %v215_v9  ;;  %v225_v24 = vmul.f32 %v223_v16, %v215_v9 }
  0x96   : > { %v243_v29 = vmul.f32 %v241_v19, %v235_v10  ;;  %v244_v30 = vmul.f32 %v242_v20, %v235_v10 }
  0x9c   : > { %v229_v27 = vpop.permute.xlu0 %228 }
  0x9d   : > { %v231_v31 = vadd.f32 %v229_v27, %v224_v23  ;;  %v232_v32 = vadd.f32 %v229_v27, %v225_v24 }
  0x9e   : > { %v249_v33 = vpop.permute.xlu1 %248 }
  0x9f   : > { %v257_v34 = vmul.f32 %v255_v21, %v249_v33  ;;  %v258_v35 = vmul.f32 %v256_v22, %v249_v33  ;;  %v245_v36 = vadd.f32 %v243_v29, %v231_v31  ;;  %v246_v37 = vadd.f32 %v244_v30, %v232_v32 }
  0xa1   : > { %v259_v40 = vadd.f32 %v257_v34, %v245_v36  ;;  %v260_v41 = vadd.f32 %v258_v35, %v246_v37 }
  0xa3   : > { %v273_v42 = vadd.f32 %v271_v38, %v259_v40  ;;  %v274_v43 = vadd.f32 %v272_v39, %v260_v41 }
  0xa5   : > { %v434_v44 = vmul.f32 -1.442695, %v273_v42  ;;  %v435_v45 = vmul.f32 -1.442695, %v274_v43 }
  0xa7   : > { %514 = vpow2.f32 %v434_v44 }
  0xa8   : > { %516 = vpow2.f32 %v435_v45 }
  0xad   : > { %v515_v46 = vpop.eup %514 }
  0xae   : > { %v517_v47 = vpop.eup %516  ;;  %v281_v48 = vadd.f32 1.0, %v515_v46 }
  0xaf   : > { %v282_v49 = vadd.f32 1.0, %v517_v47 }
  0xb0   : > { %518 = vrcp.f32 %v281_v48  ;;  %vm288_vm2 = vweird.f32 %v281_v48  ;;  %v294_v60 = vand.u32 2147483648, %v281_v48  ;;  %v292_v0 = vand.u32 2147483647, %v281_v48 }
  0xb1   : > { %520 = vrcp.f32 %v282_v49  ;;  %v309_v57 = vand.u32 2147483648, %v282_v49  ;;  %v307_v59 = vand.u32 2147483647, %v282_v49  ;;  %vm303_vm3 = vweird.f32 %v282_v49 }
  0xb2   : > { %v295_v4 = vor.u32 1.1754944e-38, %v294_v60  ;;  %vm293_vm8 = vcmp.eq.f32.partialorder %v292_v0, 8.507059e+37 }
  0xb3   : > { %v310_v1 = vor.u32 1.1754944e-38, %v309_v57  ;;  %vm308_vm6 = vcmp.eq.f32.partialorder %v307_v59, 8.507059e+37 }
  0xb6   : > { %v519_v50 = vpop.eup %518 }
  0xb7   : > { %v521_v51 = vpop.eup %520  ;;  %v284_v52 = vmul.f32 %v519_v50, %v281_v48  ;;  %vm289_vm0 = vweird.f32 %v519_v50 }
  0xb8   : > { %v299_v53 = vmul.f32 %v521_v51, %v282_v49  ;;  %vm304_vm1 = vweird.f32 %v521_v51  ;;  %vm761_vm4 = vmor %vm288_vm2, %vm289_vm0 }
  0xb9   : > { %v285_v54 = vsub.f32 1.0, %v284_v52  ;;  %vm305_vm5 = vmor %vm303_vm3, %vm304_vm1 }
  0xba   : > { %v300_v55 = vsub.f32 1.0, %v299_v53 }
  0xbb   : > { %v286_v56 = vmul.f32 %v519_v50, %v285_v54 }
  0xbc   : > { %v301_v58 = vmul.f32 %v521_v51, %v300_v55 }
  0xbd   : > { %v287_v61 = vadd.f32 %v519_v50, %v286_v56 }
  0xbe   : > { %v302_v62 = vadd.f32 %v521_v51, %v301_v58 }
  0xbf   : > { %v291_v2 = vsel %vm761_vm4, %v519_v50, %v287_v61 }
  0xc0   : > { %v306_v3 = vsel %vm305_vm5, %v521_v51, %v302_v62  ;;  %v296_v8 = vsel %vm293_vm8, %v295_v4, %v291_v2 }
  0xc1   : > { %v311_v5 = vsel %vm308_vm6, %v310_v1, %v306_v3 }
  0xc2   : > { %v315_v7 = vrot.slane %v311_v5, 4 }
  0xc4   : > { %v317_v9 = vsel %vm316_vm7, %v296_v8, %v315_v7 }
  0xc5   : > { %v319_v10 = vmul.f32 %v317_v9, %v750_v6 }
  0xc7   : > { %320 = vst [vmem:[%s206_s15] sm:$0xff] %v319_v10 }
  0xc8   : > { %579 = shalt.err (!%p576_p13)
}
  0xc9   : > { %445 = dma.vmem_to_hbm [thread:$0]  (%p711_p9), %s338_s6, 128, %s340_s7, %s322_s8  }
  0xca PF: > { %s351_s11 = sand.u32 1, %s614_s12   ;;  %p452_p0 = pnand %p427_p12, %p718_p11 }
  0xcb   : > { %s352_s28 = scalar_lea.sflag [#allocation4], %s351_s11 }
  0xcc   : > { %p453_p1 = pneg %p452_p0 }
  0xce   : > { %609 = dma.done.wait (%p453_p1), %s352_s28, 128  }
  0xcf   : > { %611 = vsyncadd (%p453_p1), %s352_s28, 4294967168  ;;  %s19_s17 = sadd.s32 1, %s634_s17   ;;  %s817_s12 = smov %s618_s13 }
  0xd0   : > { %p16_p2 = scmp.ge.s32.totalorder %s19_s17, 4   ;;  %s818_s13 = smov %s622_s14 }
  0xd1   : > { %s819_s14 = smov %s716_s26  ;;  %s820_s15 = smov %s630_s16 }
  0xd2   : > { %s821_s16 = smov %s823_s20  ;;  %18 = sbr.rel (!%p16_p2) target bundleno = 6 (0x6), region = 77 }
  0xd7   :  { %358 = vsyncpa [#allocation3], 1 }
  0xd8   :  { %360 = vsyncpa [#allocation3 + $0x1], 1 }
  0xd9   :  { %361 = vsyncpa [#allocation4], 1 }
  0xda   :  { %363 = vsyncpa [#allocation4 + $0x1], 1 }

</bundles_post_ra>
